<compile_context>
chip_gen: v7x
topology: tpu7x:2x2x1
jax: 0.10.0
libtpu: 0.0.40
codegen_flags: <defaults>
</compile_context>

<pallas_src>
import jax
import jax.numpy as jnp
from jax.experimental import pallas as pl
from jax.experimental.pallas import tpu as pltpu


def unet_conv_block_kernel(x_ref, wb1_ref, b1_ref, wb2_ref, b2_ref,
                           out_ref, pad2_ref):
    # x_ref   : (1, H+2, W*Cin)   VMEM  (H already zero-padded by the wrapper)
    # wb1_ref : (3, W*Cin, W*Cout)  banded conv1 weights (one slab per dy)
    # b1_ref  : (1, W*Cout)
    # wb2_ref : (3, W*Cout, W*Cout) banded conv2 weights
    # b2_ref  : (1, W*Cout)
    # out_ref : (1, H, W*Cout)      lane-dense output block
    # pad2_ref: (H+2, W*Cout)       VMEM scratch (H-padded conv1 activation)
    H = out_ref.shape[1]
    WCout = out_ref.shape[2]

    # ---- conv1 + ReLU : 3 banded matmuls, K = W*Cin -----------------------
    x = x_ref[0]                                        # (H+2, W*Cin)
    acc = jnp.broadcast_to(b1_ref[...], (H, WCout)).astype(jnp.float32)
    for dy in range(3):                                 # unrolled at trace time
        acc = acc + jnp.dot(x[dy:dy + H, :], wb1_ref[dy],
                            preferred_element_type=jnp.float32)

    # Zero only the two H-halo rows (interior is fully overwritten below);
    # then write relu(conv1) straight into the scratch interior so conv2 can
    # read its dy-shifted rows without any extra buffers or copies.
    pad2_ref[0:1, :] = jnp.zeros((1, WCout), jnp.float32)
    pad2_ref[H + 1:H + 2, :] = jnp.zeros((1, WCout), jnp.float32)
    pad2_ref[1:H + 1, :] = jnp.maximum(acc, 0.0)

    # ---- conv2 + ReLU : 3 banded matmuls, K = W*Cout ----------------------
    h = pad2_ref[...]                                   # (H+2, W*Cout)
    acc = jnp.broadcast_to(b2_ref[...], (H, WCout)).astype(jnp.float32)
    for dy in range(3):
        acc = acc + jnp.dot(h[dy:dy + H, :], wb2_ref[dy],
                            preferred_element_type=jnp.float32)
    out_ref[0] = jnp.maximum(acc, 0.0).astype(out_ref.dtype)


def _banded_weights(w, W):
    """(3, 3, Ci, Co) HWIO -> (3, W*Ci, W*Co) banded slabs.

    band[dy, xp*Ci+ci, x*Co+co] = w[dy, xp-x+1, ci, co] if |xp-x| <= 1 else 0.
    This folds the dx taps, the channel contraction, and the SAME-padding
    along W into a single K = W*Ci contraction per dy.
    """
    kh, kw, Ci, Co = w.shape
    x = jnp.arange(W)
    dx = x[:, None] - x[None, :] + 1                  # (xp, x)
    valid = (dx >= 0) & (dx < kw)
    band = w[:, jnp.clip(dx, 0, kw - 1)]              # (kh, xp, x, Ci, Co)
    band = jnp.where(valid[None, :, :, None, None], band, 0.0)
    band = jnp.transpose(band, (0, 1, 3, 2, 4))       # (kh, xp, Ci, x, Co)
    return band.reshape(kh, W * Ci, W * Co)


def unet_conv_block(x_nchw, w1, b1, w2, b2):
    """x_nchw: (N, Cin, H, W) f32.  Weights HWIO: w1 (3,3,Cin,Cout), w2 (3,3,Cout,Cout)."""
    N, Cin, H, W = x_nchw.shape
    Cout = w1.shape[-1]
    WCin, WCout = W * Cin, W * Cout

    # NCHW -> (N, H, W*Cin) with channels fastest on the lane axis; zero-pad H.
    x = jnp.transpose(x_nchw, (0, 2, 3, 1)).reshape(N, H, WCin)
    x = jnp.pad(x, ((0, 0), (1, 1), (0, 0)))

    wb1 = _banded_weights(w1, W)                      # (3, W*Cin,  W*Cout)
    wb2 = _banded_weights(w2, W)                      # (3, W*Cout, W*Cout)
    b1row = jnp.tile(b1, W).reshape(1, WCout)         # b1row[0, x*Cout+co] = b1[co]
    b2row = jnp.tile(b2, W).reshape(1, WCout)

    flops = 2 * N * H * W * 9 * (Cin * Cout + Cout * Cout)
    bytes_accessed = 4 * (x.size + wb1.size + wb2.size + 2 * WCout + N * H * WCout)

    out_nhwc = pl.pallas_call(
        unet_conv_block_kernel,
        out_shape=jax.ShapeDtypeStruct((N, H, WCout), x_nchw.dtype),
        grid_spec=pltpu.PrefetchScalarGridSpec(
            num_scalar_prefetch=0,
            grid=(N,),
            in_specs=[
                pl.BlockSpec((1, H + 2, WCin), lambda n: (n, 0, 0)),
                pl.BlockSpec((3, WCin, WCout), lambda n: (0, 0, 0)),
                pl.BlockSpec((1, WCout), lambda n: (0, 0)),
                pl.BlockSpec((3, WCout, WCout), lambda n: (0, 0, 0)),
                pl.BlockSpec((1, WCout), lambda n: (0, 0)),
            ],
            out_specs=pl.BlockSpec((1, H, WCout), lambda n: (n, 0, 0)),
            scratch_shapes=[pltpu.VMEM((H + 2, WCout), jnp.float32)],
        ),
        compiler_params=pltpu.CompilerParams(
            dimension_semantics=("parallel",)),
        cost_estimate=pl.CostEstimate(
            flops=flops, transcendentals=0, bytes_accessed=bytes_accessed),
    )(x, wb1, b1row, wb2, b2row)

    out = out_nhwc.reshape(N, H, W, Cout)
    return jnp.transpose(out, (0, 3, 1, 2))           # NHWC -> NCHW


def _reference(x_nchw, w1, b1, w2, b2):
    """Pure-JAX reference (lax conv) for verification."""
    dn = ("NCHW", "HWIO", "NCHW")
    y = jax.lax.conv_general_dilated(x_nchw, w1, (1, 1), "SAME",
                                     dimension_numbers=dn)
    y = jnp.maximum(y + b1[None, :, None, None], 0.0)
    y = jax.lax.conv_general_dilated(y, w2, (1, 1), "SAME",
                                     dimension_numbers=dn)
    return jnp.maximum(y + b2[None, :, None, None], 0.0)


if __name__ == "__main__":
    N, Cin, Cout, H, W = 2, 4, 8, 16, 16   # W*Cout = 128 -> lane-dense output

    key = jax.random.PRNGKey(0)
    kx, k1, kb1, k2, kb2 = jax.random.split(key, 5)

    x = jax.random.normal(kx, (N, Cin, H, W), dtype=jnp.float32)
    w1 = jax.random.normal(k1, (3, 3, Cin, Cout), dtype=jnp.float32) * 0.1
    b1 = jax.random.normal(kb1, (Cout,), dtype=jnp.float32) * 0.1
    w2 = jax.random.normal(k2, (3, 3, Cout, Cout), dtype=jnp.float32) * 0.1
    b2 = jax.random.normal(kb2, (Cout,), dtype=jnp.float32) * 0.1

    out = jax.block_until_ready(unet_conv_block(x, w1, b1, w2, b2))
    ref = jax.block_until_ready(_reference(x, w1, b1, w2, b2))

    assert out.shape == (N, Cout, H, W)
    assert jnp.allclose(out, ref, rtol=1e-3, atol=1e-3), "mismatch vs reference"

    print("KERNEL_OK")
</pallas_src>

<mosaic_0001>
module attributes {stable_mosaic.version = 11 : i64} {
  func.func @unet_conv_block_kernel(%arg0: i32, %arg1: memref<1x18x64xf32, #tpu.memory_space<vmem>>, %arg2: memref<3x64x128xf32, #tpu.memory_space<vmem>>, %arg3: memref<1x128xf32, #tpu.memory_space<vmem>>, %arg4: memref<3x128x128xf32, #tpu.memory_space<vmem>>, %arg5: memref<1x128xf32, #tpu.memory_space<vmem>>, %arg6: memref<1x16x128xf32, #tpu.memory_space<vmem>>, %arg7: memref<18x128xf32, #tpu.memory_space<vmem>>) attributes {dimension_semantics = [#tpu.dimension_semantics<parallel>], iteration_bounds = array<i64: 2>, scalar_prefetch = 0 : i64, scratch_operands = 1 : i64, tpu.core_type = #tpu.core_type<tc>, window_params = [{transform_indices = @transform_0, window_bounds = array<i64: 1, 18, 64>}, {pipeline_mode = #tpu.pipeline_mode<synchronous>, transform_indices = @transform_1, window_bounds = array<i64: 3, 64, 128>}, {pipeline_mode = #tpu.pipeline_mode<synchronous>, transform_indices = @transform_2, window_bounds = array<i64: 1, 128>}, {pipeline_mode = #tpu.pipeline_mode<synchronous>, transform_indices = @transform_3, window_bounds = array<i64: 3, 128, 128>}, {pipeline_mode = #tpu.pipeline_mode<synchronous>, transform_indices = @transform_4, window_bounds = array<i64: 1, 128>}, {transform_indices = @transform_5, window_bounds = array<i64: 1, 16, 128>}]} {
    %c0 = arith.constant 0 : index
    %c0_0 = arith.constant 0 : index
    %c0_1 = arith.constant 0 : index
    %0 = vector.load %arg1[%c0, %c0_0, %c0_1] : memref<1x18x64xf32, #tpu.memory_space<vmem>>, vector<1x18x64xf32>
    %1 = vector.shape_cast %0 : vector<1x18x64xf32> to vector<18x64xf32>
    %c0_2 = arith.constant 0 : index
    %c0_3 = arith.constant 0 : index
    %2 = vector.load %arg3[%c0_2, %c0_3] : memref<1x128xf32, #tpu.memory_space<vmem>>, vector<1x128xf32>
    %3 = vector.shape_cast %2 : vector<1x128xf32> to vector<1x128xf32>
    %4 = vector.broadcast %3 : vector<1x128xf32> to vector<16x128xf32>
    %5 = vector.extract_strided_slice %1 {offsets = [0, 0], sizes = [16, 64], strides = [1, 1]} : vector<18x64xf32> to vector<16x64xf32>
    %c0_4 = arith.constant 0 : index
    %c0_5 = arith.constant 0 : index
    %c0_6 = arith.constant 0 : index
    %6 = vector.load %arg2[%c0_4, %c0_5, %c0_6] : memref<3x64x128xf32, #tpu.memory_space<vmem>>, vector<1x64x128xf32>
    %7 = vector.shape_cast %6 : vector<1x64x128xf32> to vector<64x128xf32>
    %cst = arith.constant dense<0.000000e+00> : vector<16x128xf32>
    %8 = tpu.matmul %5, %7, %cst {dimension_numbers = #tpu.dot_dimension_numbers<[1], [0], [0], [1], [0, 0, 1, 1], [], []>} : vector<16x64xf32>, vector<64x128xf32>, vector<16x128xf32> -> vector<16x128xf32>
    %9 = arith.addf %4, %8 : vector<16x128xf32>
    %10 = vector.extract_strided_slice %1 {offsets = [1, 0], sizes = [16, 64], strides = [1, 1]} : vector<18x64xf32> to vector<16x64xf32>
    %c1 = arith.constant 1 : index
    %c0_7 = arith.constant 0 : index
    %c0_8 = arith.constant 0 : index
    %11 = vector.load %arg2[%c1, %c0_7, %c0_8] : memref<3x64x128xf32, #tpu.memory_space<vmem>>, vector<1x64x128xf32>
    %12 = vector.shape_cast %11 : vector<1x64x128xf32> to vector<64x128xf32>
    %cst_9 = arith.constant dense<0.000000e+00> : vector<16x128xf32>
    %13 = tpu.matmul %10, %12, %cst_9 {dimension_numbers = #tpu.dot_dimension_numbers<[1], [0], [0], [1], [0, 0, 1, 1], [], []>} : vector<16x64xf32>, vector<64x128xf32>, vector<16x128xf32> -> vector<16x128xf32>
    %14 = arith.addf %9, %13 : vector<16x128xf32>
    %15 = vector.extract_strided_slice %1 {offsets = [2, 0], sizes = [16, 64], strides = [1, 1]} : vector<18x64xf32> to vector<16x64xf32>
    %c2 = arith.constant 2 : index
    %c0_10 = arith.constant 0 : index
    %c0_11 = arith.constant 0 : index
    %16 = vector.load %arg2[%c2, %c0_10, %c0_11] : memref<3x64x128xf32, #tpu.memory_space<vmem>>, vector<1x64x128xf32>
    %17 = vector.shape_cast %16 : vector<1x64x128xf32> to vector<64x128xf32>
    %cst_12 = arith.constant dense<0.000000e+00> : vector<16x128xf32>
    %18 = tpu.matmul %15, %17, %cst_12 {dimension_numbers = #tpu.dot_dimension_numbers<[1], [0], [0], [1], [0, 0, 1, 1], [], []>} : vector<16x64xf32>, vector<64x128xf32>, vector<16x128xf32> -> vector<16x128xf32>
    %19 = arith.addf %14, %18 : vector<16x128xf32>
    %cst_13 = arith.constant 0.000000e+00 : f32
    %20 = vector.broadcast %cst_13 : f32 to vector<1x128xf32>
    %c0_14 = arith.constant 0 : index
    %c0_15 = arith.constant 0 : index
    %21 = vector.load %arg7[%c0_14, %c0_15] : memref<18x128xf32, #tpu.memory_space<vmem>>, vector<1x128xf32>
    tpu.vector_store %arg7[%c0_14, %c0_15], %20 {strides = array<i32>} : memref<18x128xf32, #tpu.memory_space<vmem>>, vector<1x128xf32>,
    %cst_16 = arith.constant 0.000000e+00 : f32
    %22 = vector.broadcast %cst_16 : f32 to vector<1x128xf32>
    %c17 = arith.constant 17 : index
    %c0_17 = arith.constant 0 : index
    %23 = vector.load %arg7[%c17, %c0_17] : memref<18x128xf32, #tpu.memory_space<vmem>>, vector<1x128xf32>
    tpu.vector_store %arg7[%c17, %c0_17], %22 {strides = array<i32>} : memref<18x128xf32, #tpu.memory_space<vmem>>, vector<1x128xf32>,
    %cst_18 = arith.constant 0.000000e+00 : f32
    %24 = vector.broadcast %cst_18 : f32 to vector<16x128xf32>
    %25 = arith.maximumf %19, %24 : vector<16x128xf32>
    %c1_19 = arith.constant 1 : index
    %c0_20 = arith.constant 0 : index
    %26 = vector.load %arg7[%c1_19, %c0_20] : memref<18x128xf32, #tpu.memory_space<vmem>>, vector<16x128xf32>
    tpu.vector_store %arg7[%c1_19, %c0_20], %25 {strides = array<i32>} : memref<18x128xf32, #tpu.memory_space<vmem>>, vector<16x128xf32>,
    %c0_21 = arith.constant 0 : index
    %c0_22 = arith.constant 0 : index
    %27 = vector.load %arg7[%c0_21, %c0_22] : memref<18x128xf32, #tpu.memory_space<vmem>>, vector<18x128xf32>
    %c0_23 = arith.constant 0 : index
    %c0_24 = arith.constant 0 : index
    %28 = vector.load %arg5[%c0_23, %c0_24] : memref<1x128xf32, #tpu.memory_space<vmem>>, vector<1x128xf32>
    %29 = vector.shape_cast %28 : vector<1x128xf32> to vector<1x128xf32>
    %30 = vector.broadcast %29 : vector<1x128xf32> to vector<16x128xf32>
    %31 = vector.extract_strided_slice %27 {offsets = [0, 0], sizes = [16, 128], strides = [1, 1]} : vector<18x128xf32> to vector<16x128xf32>
    %c0_25 = arith.constant 0 : index
    %c0_26 = arith.constant 0 : index
    %c0_27 = arith.constant 0 : index
    %32 = vector.load %arg4[%c0_25, %c0_26, %c0_27] : memref<3x128x128xf32, #tpu.memory_space<vmem>>, vector<1x128x128xf32>
    %33 = vector.shape_cast %32 : vector<1x128x128xf32> to vector<128x128xf32>
    %cst_28 = arith.constant dense<0.000000e+00> : vector<16x128xf32>
    %34 = tpu.matmul %31, %33, %cst_28 {dimension_numbers = #tpu.dot_dimension_numbers<[1], [0], [0], [1], [0, 0, 1, 1], [], []>} : vector<16x128xf32>, vector<128x128xf32>, vector<16x128xf32> -> vector<16x128xf32>
    %35 = arith.addf %30, %34 : vector<16x128xf32>
    %36 = vector.extract_strided_slice %27 {offsets = [1, 0], sizes = [16, 128], strides = [1, 1]} : vector<18x128xf32> to vector<16x128xf32>
    %c1_29 = arith.constant 1 : index
    %c0_30 = arith.constant 0 : index
    %c0_31 = arith.constant 0 : index
    %37 = vector.load %arg4[%c1_29, %c0_30, %c0_31] : memref<3x128x128xf32, #tpu.memory_space<vmem>>, vector<1x128x128xf32>
    %38 = vector.shape_cast %37 : vector<1x128x128xf32> to vector<128x128xf32>
    %cst_32 = arith.constant dense<0.000000e+00> : vector<16x128xf32>
    %39 = tpu.matmul %36, %38, %cst_32 {dimension_numbers = #tpu.dot_dimension_numbers<[1], [0], [0], [1], [0, 0, 1, 1], [], []>} : vector<16x128xf32>, vector<128x128xf32>, vector<16x128xf32> -> vector<16x128xf32>
    %40 = arith.addf %35, %39 : vector<16x128xf32>
    %41 = vector.extract_strided_slice %27 {offsets = [2, 0], sizes = [16, 128], strides = [1, 1]} : vector<18x128xf32> to vector<16x128xf32>
    %c2_33 = arith.constant 2 : index
    %c0_34 = arith.constant 0 : index
    %c0_35 = arith.constant 0 : index
    %42 = vector.load %arg4[%c2_33, %c0_34, %c0_35] : memref<3x128x128xf32, #tpu.memory_space<vmem>>, vector<1x128x128xf32>
    %43 = vector.shape_cast %42 : vector<1x128x128xf32> to vector<128x128xf32>
    %cst_36 = arith.constant dense<0.000000e+00> : vector<16x128xf32>
    %44 = tpu.matmul %41, %43, %cst_36 {dimension_numbers = #tpu.dot_dimension_numbers<[1], [0], [0], [1], [0, 0, 1, 1], [], []>} : vector<16x128xf32>, vector<128x128xf32>, vector<16x128xf32> -> vector<16x128xf32>
    %45 = arith.addf %40, %44 : vector<16x128xf32>
    %cst_37 = arith.constant 0.000000e+00 : f32
    %46 = vector.broadcast %cst_37 : f32 to vector<16x128xf32>
    %47 = arith.maximumf %45, %46 : vector<16x128xf32>
    %c0_38 = arith.constant 0 : index
    %c0_39 = arith.constant 0 : index
    %c0_40 = arith.constant 0 : index
    %48 = vector.load %arg6[%c0_38, %c0_39, %c0_40] : memref<1x16x128xf32, #tpu.memory_space<vmem>>, vector<1x16x128xf32>
    %49 = vector.shape_cast %48 : vector<1x16x128xf32> to vector<16x128xf32>
    %50 = vector.shape_cast %47 : vector<16x128xf32> to vector<1x16x128xf32>
    tpu.vector_store %arg6[%c0_38, %c0_39, %c0_40], %50 {strides = array<i32>} : memref<1x16x128xf32, #tpu.memory_space<vmem>>, vector<1x16x128xf32>,
    return
  }
  func.func @transform_0(%arg0: i32) -> (i32, i32, i32) {
    %c0_i32 = arith.constant 0 : i32
    %c0_i32_0 = arith.constant 0 : i32
    %c0_i32_1 = arith.constant 0 : i32
    return %arg0, %c0_i32, %c0_i32_0 : i32, i32, i32
  }
  func.func @transform_1(%arg0: i32) -> (i32, i32, i32) {
    %c0_i32 = arith.constant 0 : i32
    %c0_i32_0 = arith.constant 0 : i32
    %c0_i32_1 = arith.constant 0 : i32
    %c0_i32_2 = arith.constant 0 : i32
    return %c0_i32, %c0_i32_0, %c0_i32_1 : i32, i32, i32
  }
  func.func @transform_2(%arg0: i32) -> (i32, i32) {
    %c0_i32 = arith.constant 0 : i32
    %c0_i32_0 = arith.constant 0 : i32
    %c0_i32_1 = arith.constant 0 : i32
    return %c0_i32, %c0_i32_0 : i32, i32
  }
  func.func @transform_3(%arg0: i32) -> (i32, i32, i32) {
    %c0_i32 = arith.constant 0 : i32
    %c0_i32_0 = arith.constant 0 : i32
    %c0_i32_1 = arith.constant 0 : i32
    %c0_i32_2 = arith.constant 0 : i32
    return %c0_i32, %c0_i32_0, %c0_i32_1 : i32, i32, i32
  }
  func.func @transform_4(%arg0: i32) -> (i32, i32) {
    %c0_i32 = arith.constant 0 : i32
    %c0_i32_0 = arith.constant 0 : i32
    %c0_i32_1 = arith.constant 0 : i32
    return %c0_i32, %c0_i32_0 : i32, i32
  }
  func.func @transform_5(%arg0: i32) -> (i32, i32, i32) {
    %c0_i32 = arith.constant 0 : i32
    %c0_i32_0 = arith.constant 0 : i32
    %c0_i32_1 = arith.constant 0 : i32
    return %arg0, %c0_i32, %c0_i32_0 : i32, i32, i32
  }
}

</mosaic_0001>

<bundles_post_ra>
// kernel: tpu_custom_call.1
= control target key start
LH: loop header
LB: loop body
LE: loop exit
PB: predicated region body
PF: predicated region fallthrough
CT: control target
= control target key end

     0   :  { %10 = vsyncpa [#allocation4], 0  ;;  %s1832_s0 = inlined_call_operand.vmem [shape: f32[2,18,64], index: 0, kind: input, shape index: {}]   ;;  %s1833_s1 = inlined_call_operand.hbm [shape: f32[3,64,128], index: 1, kind: input, shape index: {}]   ;;  %s1834_s2 = inlined_call_operand.vmem [shape: f32[1,128], index: 2, kind: input, shape index: {}]   ;;  %s1835_s3 = inlined_call_operand.hbm [shape: f32[3,128,128], index: 3, kind: input, shape index: {}]   ;;  %s1836_s4 = inlined_call_operand.vmem [shape: f32[1,128], index: 4, kind: input, shape index: {}]   ;;  %s1837_s5 = inlined_call_operand.hbm [shape: f32[2,16,128], index: 5, kind: output, shape index: {}]  }
   0x1   :  { %11 = vsyncpa [#allocation7], 0 }
   0x2   :  { %12 = vsyncpa [#allocation5], 0 }
   0x3   :  { %14 = vsyncpa [#allocation5 + $0x1], 0  ;;  %s1622_s18 = smov 0   ;;  %s1624_s19 = smov 0  }
   0x4   :  { %s1626_s20 = smov 0   ;;  %s1628_s21 = smov 0  }
   0x5 LB: > { %s1643_s22 = sadd.s32 4294967295, %s1582_s21   ;;  %s964_s23 = sadd.s32 4294967294, %s1582_s21   ;;  %s1582_s21 = sphi %s1628_s21, %s1855_s21   ;;  %s1578_s20 = sphi %s1626_s20, %s1854_s20   ;;  %s1574_s19 = sphi %s1624_s19, %s1853_s19   ;;  %s1570_s18 = sphi %s1622_s18, %s1852_s18  }
   0x6   : > { %s1647_s24 = sadd.s32 1, %s1582_s21   ;;  %s137_s25 = sadd.s32 1, %s1578_s20 }
   0x7   : > { %s134_s26 = ssub.s32 %s1582_s21, %s1647_s24  ;;  %p147_p0 = scmp.ne.s32.totalorder %s1578_s20, %s1574_s19 }
   0x8   : > { %p135_p1 = scmp.eq.s32.totalorder %s134_s26, 0  ;;  %p148_p2 = scmp.eq.s32.totalorder %s1643_s22, 1 }
   0x9   : > { %p153_p3 = scmp.ne.s32.totalorder %s1574_s19, %s1570_s18  ;;  %p154_p4 = scmp.eq.s32.totalorder %s964_s23, 1 }
   0xa   : > { %s1658_s27 = scalar_select %p135_p1, %s1578_s20, %s137_s25  }
   0xb   : > { %p1660_p5 = por %p148_p2, %p147_p0  ;;  %p1664_p6 = por %p154_p4, %p153_p3 }
   0xc   : > { %p965_p7 = scmp.ge.s32.totalorder %s1582_s21, 1  ;;  %p161_p8 = scmp.lt.s32.totalorder %s1582_s21, 3 }
   0xd   : > { %s1841_s28 = scalar_select %p1660_p5, 1, 0 }
   0xe   : > { %s1842_s29 = scalar_select %p1664_p6, 1, 0 }
   0xf   : > { %p1838_p9 = scmp.eq.s32.totalorder %s1643_s22, 0  ;;  %p1671_p10 = pnand %p965_p7, %p161_p8 }
  0x10   : > { %s1584_s6 = smov [#allocation3]   ;;  %s1585_s9 = smov [#allocation6]  }
  0x11   : > { %s1843_s30 = scalar_select %p1671_p10, 1, 0 }
  0x12   : > { %s173_s7 = sshll.u32 %s1584_s6, 4  ;;  %p1401_p11 = pneg %p1671_p10  ;;  %s174_s7 = int_to_ptr.vmem [resolvable:$true] %s173_s7 }
  0x13   : > { %s189_s10 = sshll.u32 %s1585_s9, 4  ;;  %s1456_s13 = scalar_lea.hbm %s1833_s1, 3072  ;;  %s1683_s10 = int_to_ptr.vmem [resolvable:$true] %s189_s10 }
  0x14   : > { %p1679_p12 = pnand %p1838_p9, %p1401_p11  ;;  %p1457_p13 = scmp.ne.s32.totalorder %s1833_s1, %s1456_s13 }
  0x15   : > { %p1463_p3 = scmp.lt.u32.totalorder %s1456_s13, %s1833_s1 }
  0x16   : > { %p1458_p0 = pneg %p1679_p12 }
  0x18   : > { %p1459_p1 = pnand %p1458_p0, %p1457_p13 }
  0x1a   : > { %p1460_p2 = pneg %p1459_p1 }
  0x1c   : > { %p1465_p4 = pnand %p1463_p3, %p1460_p2 }
  0x1e   : > { %1468 = shalt.err (!%p1465_p4)
}
  0x1f   : > { %s1469_s23 = scalar_lea.vmem %s174_s7, 3072  ;;  %p1477_p9 = scmp.lt.s32.totalorder %s174_s7, %s174_s7 }
  0x20   : > { %p1470_p7 = scmp.ne.s32.totalorder %s174_s7, %s1469_s23  ;;  %p1478_p6 = scmp.lt.s32.totalorder %s1469_s23, %s1469_s23 }
  0x22   : > { %p1472_p8 = pnand %p1470_p7, %p1458_p0  ;;  %p1479_p5 = por %p1478_p6, %p1477_p9 }
  0x24   : > { %p1473_p11 = pneg %p1472_p8 }
  0x26   : > { %p1480_p10 = pnand %p1479_p5, %p1473_p11 }
  0x28   : > { %1483 = shalt.err (!%p1480_p10)
}
  0x29   : > { %s1586_s25 = smov 128   ;;  %s1587_s26 = smov 8  }
  0x2a   : > { %1404 = dma.hbm_to_vmem [thread:$0]  (!%p1679_p12), %s1833_s1, 3072, %s174_s7, [#allocation4], %s1586_s25, %s1586_s25, %s1587_s26  }
  0x2b   : > { %s1484_s13 = scalar_lea.hbm %s1835_s3, 6144 }
  0x2c   : > { %p1485_p13 = scmp.ne.s32.totalorder %s1835_s3, %s1484_s13  ;;  %p1491_p9 = scmp.lt.u32.totalorder %s1484_s13, %s1835_s3 }
  0x2e   : > { %p1487_p5 = pnand %p1485_p13, %p1458_p0 }
  0x30   : > { %p1488_p6 = pneg %p1487_p5 }
  0x32   : > { %p1493_p10 = pnand %p1491_p9, %p1488_p6 }
  0x34   : > { %1496 = shalt.err (!%p1493_p10)
}
  0x35   : > { %s1497_s7 = scalar_lea.vmem %s1683_s10, 6144  ;;  %p1505_p4 = scmp.lt.s32.totalorder %s1683_s10, %s1683_s10 }
  0x36   : > { %p1498_p1 = scmp.ne.s32.totalorder %s1683_s10, %s1497_s7  ;;  %p1506_p7 = scmp.lt.s32.totalorder %s1497_s7, %s1497_s7 }
  0x38   : > { %p1500_p2 = pnand %p1498_p1, %p1458_p0  ;;  %p1507_p8 = por %p1506_p7, %p1505_p4 }
  0x3a   : > { %p1501_p3 = pneg %p1500_p2 }
  0x3c   : > { %p1508_p11 = pnand %p1507_p8, %p1501_p3 }
  0x3e   : > { %1511 = shalt.err (!%p1508_p11)
}
  0x3f   : > { %1407 = dma.hbm_to_vmem [thread:$0]  (!%p1679_p12), %s1835_s3, 6144, %s1683_s10, [#allocation7], %s1586_s25, %s1586_s25, %s1587_s26  }
  0x40   : > { %p1845_p13 = scmp.ne.s32.totalorder %s1843_s30, 0 }
  0x41   : > { %p1846_p5 = scmp.eq.s32.totalorder (!%p1845_p13), %s1643_s22, 0 }
  0x42   : > { %216 = sbr.rel (%p1845_p13) target bundleno = 622 (0x26e), region = 40 }
  0x49   : > { %1557 = dma.done.wait (%p1846_p5), [#allocation4], 3072   ;;  %p1847_p0 = pmov %p1846_p5 }
  0x4b   : > { %1559 = vsyncadd (%p1847_p0), [#allocation4], 4294964224  ;;  %p1848_p6 = pmov %p1847_p0 }
  0x4c   : > { %p1849_p9 = pmov %p1847_p0 }
  0x4d   : > { %1561 = dma.done.wait (%p1848_p6), [#allocation7], 6144  }
  0x4e   : > { %1563 = vsyncadd (%p1849_p9), [#allocation7], 4294961152  ;;  %p248_p10 = scmp.lt.s32.totalorder %s1643_s22, 1  ;;  %v263_v0 = vld [vmem:[#allocation3] sm:$0xff]  ;;  %v264_v1 = vld [vmem:[#allocation3 + $0x8] sm:$0xff]  ;;  %vm271_vm0 = vcmask 523264  }
  0x4f   : > { %v265_v2 = vld [vmem:[#allocation3 + $0x10] sm:$0xff]  ;;  %v1234_v3 = vpack.c.bf16 %v264_v1, %v263_v0  ;;  %v266_v4 = vld [vmem:[#allocation3 + $0x18] sm:$0xff]  ;;  %v267_v6 = vld [vmem:[#allocation3 + $0x20] sm:$0xff]  ;;  %vm365_vm1 = vcmask 1046528   ;;  %vm461_vm2 = vcmask 1045504   ;;  %s245_s12 = sand.u32 1, %s1574_s19  }
  0x50   : > { %s249_s8 = scalar_select %p248_p10, %s1643_s22, 1  ;;  %v1238_v5 = vpack.c.bf16 %v266_v4, %v265_v2  ;;  %v268_v7 = vld [vmem:[#allocation3 + $0x28] sm:$0xff]  ;;  %v269_v10 = vld [vmem:[#allocation3 + $0x30] sm:$0xff]  ;;  %v270_v11 = vld [vmem:[#allocation3 + $0x38] sm:$0xff] }
  0x51   : > { %1235 = vmatprep.subr.bf16.mxu0 %v1234_v3  ;;  %v1242_v9 = vpack.c.bf16 %v268_v7, %v267_v6  ;;  %v1246_v12 = vpack.c.bf16 %v270_v11, %v269_v10  ;;  %v658_v13 = vld [vmem:[#allocation6 + $0x80] sm:$0xff]  ;;  %v357_v15 = vld [vmem:[#allocation3 + $0x48] sm:$0xff]  ;;  %v660_v18 = vld [vmem:[#allocation6 + $0x90] sm:$0xff]  ;;  %s972_s13 = sshll.u32 %s245_s12, 4  ;;  %s987_s7 = sshll.u32 %s1643_s22, 8 }
  0x52   : > { %s1390_s10 = smul.u32 24, %s249_s8  ;;  %1237 = vmatpush3.bf16.msra.mxu0 %v1234_v3  ;;  %v356_v14 = vld [vmem:[#allocation3 + $0x40] sm:$0xff]  ;;  %v659_v16 = vld [vmem:[#allocation6 + $0x88] sm:$0xff]  ;;  %v661_v19 = vld [vmem:[#allocation6 + $0x98] sm:$0xff]  ;;  %s247_s16 = scalar_lea.vmem [#allocation8], %s972_s13 }
  0x53   : > { %1239 = vmatprep.subr.bf16.mxu0 %v1238_v5  ;;  %v1314_v17 = vpack.c.bf16 %v659_v16, %v658_v13  ;;  %v1318_v21 = vpack.c.bf16 %v661_v19, %v660_v18  ;;  %v662_v22 = vld [vmem:[#allocation6 + $0xa0] sm:$0xff]  ;;  %v663_v23 = vld [vmem:[#allocation6 + $0xa8] sm:$0xff]  ;;  %v1250_v25 = vpack.c.bf16 %v357_v15, %v356_v14  ;;  %v358_v27 = vld [vmem:[#allocation3 + $0x50] sm:$0xff]  ;;  %s880_s17 = sshll.u32 %s247_s16, 4  ;;  %s1789_s8 = scalar_lea.hbm %s1837_s5, %s987_s7  ;;  %s1784_s17 = int_to_ptr.vmem [resolvable:$true] %s880_s17 }
  0x54   : > { %s1747_s26 = scalar_lea.vmem %s1832_s0, %s1390_s10  ;;  %v359_v28 = vld [vmem:[#allocation3 + $0x58] sm:$0xff]  ;;  %v1322_v29 = vpack.c.bf16 %v663_v23, %v662_v22  ;;  %v664_v30 = vld [vmem:[#allocation6 + $0xb0] sm:$0xff]  ;;  %v360_v34 = vld [vmem:[#allocation3 + $0x60] sm:$0xff]  ;;  %s1791_s10 = scalar_lea.sflag [#allocation5], %s245_s12 }
  0x55   : > { %v1750_v8 = vld [vmem:[%s1747_s26] sm:$0xff]  ;;  %v1755_v20 = vld [vmem:[%s1747_s26 + $0x8] sm:$0xff]  ;;  %1315 = vmatprep.subr.bf16.mxu1 %v1314_v17  ;;  %v665_v31 = vld [vmem:[#allocation6 + $0xb8] sm:$0xff]  ;;  %v1254_v32 = vpack.c.bf16 %v359_v28, %v358_v27  ;;  %s1512_s22 = scalar_lea.vmem %s1784_s17, 256  ;;  %p1850_p1 = scmp.ne.s32.totalorder %s1841_s28, 0 }
  0x56   : > { %1088 = vmatprep.mubr.msk.f32.mxu0 %vm271_vm0, %v1750_v8  ;;  %1241 = vmatpush3.bf16.msra.mxu0 %v1238_v5  ;;  %v366_v24 = vrot.slane %v1750_v8, 1  ;;  %v367_v26 = vrot.slane %v1755_v20, 1  ;;  %v361_v35 = vld [vmem:[#allocation3 + $0x68] sm:$0xff]  ;;  %v1326_v36 = vpack.c.bf16 %v665_v31, %v664_v30  ;;  %v362_v38 = vld [vmem:[#allocation3 + $0x70] sm:$0xff]  ;;  %v363_v39 = vld [vmem:[#allocation3 + $0x78] sm:$0xff]  ;;  %v462_v45 = vrot.slane %v1750_v8, 2  ;;  %p1513_p12 = scmp.ne.s32.totalorder %s1784_s17, %s1512_s22 }
  0x57   : > { %1243 = vmatprep.subr.bf16.mxu0 %v1242_v9  ;;  %1317 = vmatpush3.bf16.msra.mxu1 %v1314_v17  ;;  %v1258_v37 = vpack.c.bf16 %v361_v35, %v360_v34  ;;  %v255_v40 = vld [vmem:[%s1747_s26 + $0x10] sm:$0x3]  ;;  %v1262_v41 = vpack.c.bf16 %v363_v39, %v362_v38  ;;  %v453_v42 = vld [vmem:[#allocation3 + $0x80] sm:$0xff]  ;;  %v454_v43 = vld [vmem:[#allocation3 + $0x88] sm:$0xff]  ;;  %v463_v46 = vrot.slane %v1755_v20, 2  ;;  %s1589_s25 = smov [#allocation8]  }
  0x58   : > { %1319 = vmatprep.subr.bf16.mxu1 %v1318_v21  ;;  %v368_v33 = vsel %vm365_vm1, %v366_v24, %v367_v26  ;;  %v369_v44 = vrot.slane %v255_v40, 1  ;;  %v1266_v47 = vpack.c.bf16 %v454_v43, %v453_v42  ;;  %v455_v48 = vld [vmem:[#allocation3 + $0x90] sm:$0xff]  ;;  %v456_v49 = vld [vmem:[#allocation3 + $0x98] sm:$0xff]  ;;  %v457_v53 = vld [vmem:[#allocation3 + $0xa0] sm:$0xff]  ;;  %v465_v61 = vrot.slane %v255_v40, 2  ;;  %p1514_p2 = pnand %p1513_p12, %p1850_p1  ;;  %s1516_s30 = sshll.u32 %s1589_s25, 4  ;;  %s1517_s30 = int_to_ptr.vmem [resolvable:$false] %s1516_s30 }
  0x59   : > { %v1270_v51 = vpack.c.bf16 %v456_v49, %v455_v48  ;;  %v464_v52 = vsel %vm461_vm2, %v462_v45, %v463_v46  ;;  %v458_v54 = vld [vmem:[#allocation3 + $0xa8] sm:$0xff]  ;;  %v459_v56 = vld [vmem:[#allocation3 + $0xb0] sm:$0xff]  ;;  %v460_v57 = vld [vmem:[#allocation3 + $0xb8] sm:$0xff]  ;;  %v1588_v24 = vmov 0.0   ;;  %s1518_s26 = scalar_lea.vmem %s1517_s30, 512  ;;  %p1519_p4 = scmp.lt.s32.totalorder %s1784_s17, %s1517_s30 }
  0x5a   : > { %1245 = vmatpush3.bf16.msra.mxu0 %v1242_v9  ;;  %v370_v50 = vsel %vm365_vm1, %v367_v26, %v369_v44  ;;  %v1274_v55 = vpack.c.bf16 %v458_v54, %v457_v53  ;;  %v1278_v58 = vpack.c.bf16 %v460_v57, %v459_v56  ;;  %v564_v59 = vld [vmem:[#allocation6] sm:$0xff]  ;;  %v565_v60 = vld [vmem:[#allocation6 + $0x8] sm:$0xff]  ;;  %v566_v63 = vld [vmem:[#allocation6 + $0x10] sm:$0xff]  ;;  %v466_v1 = vsel %vm461_vm2, %v463_v46, %v465_v61  ;;  %p1515_p3 = pneg %p1514_p2  ;;  %p1520_p7 = scmp.lt.s32.totalorder %s1518_s26, %s1512_s22 }
  0x5b   : > { %1247 = vmatprep.subr.bf16.mxu0 %v1246_v12  ;;  %1321 = vmatpush3.bf16.msra.mxu1 %v1318_v21  ;;  %v1282_v62 = vpack.c.bf16 %v565_v60, %v564_v59  ;;  %v567_v0 = vld [vmem:[#allocation6 + $0x18] sm:$0xff]  ;;  %v568_v3 = vld [vmem:[#allocation6 + $0x20] sm:$0xff]  ;;  %v569_v4 = vld [vmem:[#allocation6 + $0x28] sm:$0xff]  ;;  %548 = vst [vmem:[#allocation2] sm:$0x1] %v1588_v24 }
  0x5c   : > { %1323 = vmatprep.subr.bf16.mxu1 %v1322_v29  ;;  %v1286_v2 = vpack.c.bf16 %v567_v0, %v566_v63  ;;  %v1290_v5 = vpack.c.bf16 %v569_v4, %v568_v3  ;;  %v570_v6 = vld [vmem:[#allocation6 + $0x30] sm:$0xff]  ;;  %v571_v7 = vld [vmem:[#allocation6 + $0x38] sm:$0xff]  ;;  %v572_v9 = vld [vmem:[#allocation6 + $0x40] sm:$0xff]  ;;  %549 = vst [vmem:[#allocation2 + $0x11] sm:$0x1] %v1588_v24  ;;  %p1521_p8 = por %p1520_p7, %p1519_p4 }
  0x5d   : > { %v1294_v8 = vpack.c.bf16 %v571_v7, %v570_v6  ;;  %v573_v10 = vld [vmem:[#allocation6 + $0x48] sm:$0xff]  ;;  %v574_v15 = vld [vmem:[#allocation6 + $0x50] sm:$0xff]  ;;  %v575_v16 = vld [vmem:[#allocation6 + $0x58] sm:$0xff] }
  0x5e   : > { %1249 = vmatpush3.bf16.msra.mxu0 %v1246_v12  ;;  %v1298_v11 = vpack.c.bf16 %v573_v10, %v572_v9  ;;  %v666_v12 = vld [vmem:[#allocation6 + $0xc0] sm:$0xff]  ;;  %v667_v13 = vld [vmem:[#allocation6 + $0xc8] sm:$0xff]  ;;  %v1302_v17 = vpack.c.bf16 %v575_v16, %v574_v15  ;;  %v668_v18 = vld [vmem:[#allocation6 + $0xd0] sm:$0xff]  ;;  %p1522_p11 = pnand %p1521_p8, %p1515_p3 }
  0x5f   : > { %1251 = vmatprep.subr.bf16.mxu0 %v1250_v25  ;;  %1325 = vmatpush3.bf16.msra.mxu1 %v1322_v29  ;;  %v1330_v14 = vpack.c.bf16 %v667_v13, %v666_v12  ;;  %v669_v19 = vld [vmem:[#allocation6 + $0xd8] sm:$0xff]  ;;  %v576_v21 = vld [vmem:[#allocation6 + $0x60] sm:$0xff]  ;;  %v577_v22 = vld [vmem:[#allocation6 + $0x68] sm:$0xff] }
  0x60   : > { %1327 = vmatprep.subr.bf16.mxu1 %v1326_v36  ;;  %v1306_v23 = vpack.c.bf16 %v577_v22, %v576_v21  ;;  %v671_v26 = vld [vmem:[#allocation6 + $0xe8] sm:$0xff]  ;;  %v578_v27 = vld [vmem:[#allocation6 + $0x70] sm:$0xff]  ;;  %v579_v29 = vld [vmem:[#allocation6 + $0x78] sm:$0xff] }
  0x61   : > { %1089 = vmatmul.mubr.msk.f32.vlgmr.msra.gmra.mrb[0].mxu0 %vm271_vm0, %v1755_v20  ;;  %v1334_v20 = vpack.c.bf16 %v669_v19, %v668_v18  ;;  %v672_v30 = vld [vmem:[#allocation6 + $0xf0] sm:$0xff]  ;;  %v673_v31 = vld [vmem:[#allocation6 + $0xf8] sm:$0xff]  ;;  %v762_v34 = vld [vmem:[#allocation6 + $0x100] sm:$0xff] }
  0x62   : > { %1253 = vmatpush3.bf16.msra.mxu0 %v1250_v25  ;;  %1107 = vmatprep.mubr.msk.f32.mxu0 %vm271_vm0, %v368_v33  ;;  %v670_v25 = vld [vmem:[#allocation6 + $0xe0] sm:$0xff]  ;;  %v1342_v33 = vpack.c.bf16 %v673_v31, %v672_v30  ;;  %v763_v35 = vld [vmem:[#allocation6 + $0x108] sm:$0xff]  ;;  %v764_v45 = vld [vmem:[#allocation6 + $0x110] sm:$0xff] }
  0x63   : > { %1255 = vmatprep.subr.bf16.mxu0 %v1254_v32  ;;  %1329 = vmatpush3.bf16.msra.mxu1 %v1326_v36  ;;  %v1338_v28 = vpack.c.bf16 %v671_v26, %v670_v25  ;;  %v1346_v36 = vpack.c.bf16 %v763_v35, %v762_v34  ;;  %v765_v49 = vld [vmem:[#allocation6 + $0x118] sm:$0xff]  ;;  %v766_v57 = vld [vmem:[#allocation6 + $0x120] sm:$0xff]  ;;  %v768_v61 = vld [vmem:[#allocation6 + $0x130] sm:$0xff] }
  0x64   : > { %1331 = vmatprep.subr.bf16.mxu1 %v1330_v14  ;;  %v1350_v56 = vpack.c.bf16 %v765_v49, %v764_v45  ;;  %v770_v0 = vld [vmem:[#allocation6 + $0x140] sm:$0xff]  ;;  %v772_v3 = vld [vmem:[#allocation6 + $0x150] sm:$0xff]  ;;  %v773_v4 = vld [vmem:[#allocation6 + $0x158] sm:$0xff] }
  0x65   : > { %v774_v6 = vld [vmem:[#allocation6 + $0x160] sm:$0xff]  ;;  %v775_v7 = vld [vmem:[#allocation6 + $0x168] sm:$0xff]  ;;  %v776_v9 = vld [vmem:[#allocation6 + $0x170] sm:$0xff] }
  0x66   : > { %1257 = vmatpush3.bf16.msra.mxu0 %v1254_v32  ;;  %v1310_v32 = vpack.c.bf16 %v579_v29, %v578_v27  ;;  %v777_v10 = vld [vmem:[#allocation6 + $0x178] sm:$0xff]  ;;  %v981_v16 = vld [vmem:[%s1836_s4] ss:$0 sm:$0xff] }
  0x67   : > { %1259 = vmatprep.subr.bf16.mxu0 %v1258_v37  ;;  %1333 = vmatpush3.bf16.msra.mxu1 %v1330_v14 }
  0x68   : > { %1335 = vmatprep.subr.bf16.mxu1 %v1334_v20 }
  0x6a   : > { %1261 = vmatpush3.bf16.msra.mxu0 %v1258_v37  ;;  %v974_v37 = vld [vmem:[%s1834_s2] ss:$0 sm:$0xff] }
  0x6b   : > { %1263 = vmatprep.subr.bf16.mxu0 %v1262_v41  ;;  %1337 = vmatpush3.bf16.msra.mxu1 %v1334_v20 }
  0x6c   : > { %1339 = vmatprep.subr.bf16.mxu1 %v1338_v28 }
  0x6e   : > { %1265 = vmatpush3.bf16.msra.mxu0 %v1262_v41 }
  0x6f   : > { %1267 = vmatprep.subr.bf16.mxu0 %v1266_v47  ;;  %1341 = vmatpush3.bf16.msra.mxu1 %v1338_v28 }
  0x70   : > { %1343 = vmatprep.subr.bf16.mxu1 %v1342_v33 }
  0x71   : > { %1108 = vmatmul.mubr.msk.f32.vlgmr.msra.gmra.mrb[0].mxu0 %vm271_vm0, %v370_v50 }
  0x72   : > { %1269 = vmatpush3.bf16.msra.mxu0 %v1266_v47  ;;  %1126 = vmatprep.mubr.msk.f32.mxu0 %vm271_vm0, %v464_v52 }
  0x73   : > { %1271 = vmatprep.subr.bf16.mxu0 %v1270_v51  ;;  %1345 = vmatpush3.bf16.msra.mxu1 %v1342_v33 }
  0x74   : > { %1347 = vmatprep.subr.bf16.mxu1 %v1346_v36 }
  0x76   : > { %1273 = vmatpush3.bf16.msra.mxu0 %v1270_v51 }
  0x77   : > { %1275 = vmatprep.subr.bf16.mxu0 %v1274_v55 }
  0x7a   : > { %1277 = vmatpush3.bf16.msra.mxu0 %v1274_v55 }
  0x7b   : > { %1279 = vmatprep.subr.bf16.mxu0 %v1278_v58 }
  0x7e   : > { %1281 = vmatpush3.bf16.msra.mxu0 %v1278_v58  ;;  %v767_v58 = vld [vmem:[#allocation6 + $0x128] sm:$0xff] }
  0x7f   : > { %1283 = vmatprep.subr.bf16.mxu0 %v1282_v62  ;;  %v1354_v60 = vpack.c.bf16 %v767_v58, %v766_v57 }
  0x81   : > { %1127 = vmatmul.mubr.msk.f32.vlgmr.msra.gmra.mrb[0].mxu0 %vm271_vm0, %v466_v1  ;;  %v771_v1 = vld [vmem:[#allocation6 + $0x148] sm:$0xff] }
  0x82   : > { %1285 = vmatpush3.bf16.msra.mxu0 %v1282_v62  ;;  %v769_v62 = vld [vmem:[#allocation6 + $0x138] sm:$0xff] }
  0x83   : > { %1287 = vmatprep.subr.bf16.mxu0 %v1286_v2  ;;  %v1358_v63 = vpack.c.bf16 %v769_v62, %v768_v61 }
  0x86   : > { %1289 = vmatpush3.bf16.msra.mxu0 %v1286_v2  ;;  %v1362_v2 = vpack.c.bf16 %v771_v1, %v770_v0 }
  0x87   : > { %1291 = vmatprep.subr.bf16.mxu0 %v1290_v5 }
  0x8a   : > { %1293 = vmatpush3.bf16.msra.mxu0 %v1290_v5  ;;  %v1366_v5 = vpack.c.bf16 %v773_v4, %v772_v3 }
  0x8b   : > { %1295 = vmatprep.subr.bf16.mxu0 %v1294_v8 }
  0x8e   : > { %1297 = vmatpush3.bf16.msra.mxu0 %v1294_v8  ;;  %v1370_v8 = vpack.c.bf16 %v775_v7, %v774_v6 }
  0x8f   : > { %1299 = vmatprep.subr.bf16.mxu0 %v1298_v11 }
  0x92   : > { %1301 = vmatpush3.bf16.msra.mxu0 %v1298_v11  ;;  %v1374_v11 = vpack.c.bf16 %v777_v10, %v776_v9 }
  0x93   : > { %1303 = vmatprep.subr.bf16.mxu0 %v1302_v17 }
  0x96   : > { %1305 = vmatpush3.bf16.msra.mxu0 %v1302_v17 }
  0x97   : > { %1307 = vmatprep.subr.bf16.mxu0 %v1306_v23 }
  0x9a   : > { %1309 = vmatpush3.bf16.msra.mxu0 %v1306_v23 }
  0x9b   : > { %1311 = vmatprep.subr.bf16.mxu0 %v1310_v32 }
  0x9e   : > { %1313 = vmatpush3.bf16.msra.mxu0 %v1310_v32 }
 0x154   : > { %v1128_v38 = vpop.f32.mrb[0].mxu0 }
 0x155   : > { %v1378_v39 = vadd.f32 %v1128_v38, %v974_v37  ;;  %v537_v40 = vpop.f32.mrb[1].mxu0 }
 0x156   : > { %v1379_v41 = vadd.f32 %v974_v37, %v537_v40 }
 0x157   : > { %v551_v42 = vmax.f32 %v1378_v39, 0.0 }
 0x158   : > { %v550_v43 = vmax.f32 %v1379_v41, 0.0 }
 0x159   : > { %553 = vst [vmem:[#allocation2 + $0x9] sm:$0xff] %v551_v42 }
 0x15a   : > { %552 = vst [vmem:[#allocation2 + $0x1] sm:$0xff] %v550_v43 }
 0x160   : > { %v556_v44 = vld [vmem:[#allocation2 + $0x10] sm:$0x3] }
 0x161   : > { %v554_v46 = vld [vmem:[#allocation2] sm:$0xff]  ;;  %v555_v47 = vld [vmem:[#allocation2 + $0x8] sm:$0xff]  ;;  %v680_v48 = vrot.slane %v556_v44, 1  ;;  %v781_v12 = vrot.slane %v556_v44, 2 }
 0x162   : > { %1161 = vmatprep.mubr.f32.mxu0 %v554_v46  ;;  %v677_v50 = vrot.slane %v554_v46, 1  ;;  %v778_v51 = vrot.slane %v554_v46, 2  ;;  %v779_v52 = vrot.slane %v555_v47, 2  ;;  %v678_v53 = vrot.slane %v555_v47, 1 }
 0x163   : > { %1162 = vmatmul.mubr.f32.vlgmr.msra.gmra.mrb[2].mxu0 %v555_v47 }
 0x164   : > { %v679_v54 = vsel %vm365_vm1, %v677_v50, %v678_v53  ;;  %v681_v55 = vsel %vm365_vm1, %v678_v53, %v680_v48  ;;  %v780_v59 = vsel %vm461_vm2, %v778_v51, %v779_v52  ;;  %v782_v13 = vsel %vm461_vm2, %v779_v52, %v781_v12 }
 0x165   : > { %1196 = vmatprep.mubr.f32.mxu1 %v679_v54 }
 0x166   : > { %1197 = vmatmul.mubr.f32.vlgmr.msra.gmra.mrb[0].mxu1 %v681_v55 }
 0x167   : > { %1349 = vmatpush3.bf16.msra.mxu1 %v1346_v36  ;;  %1231 = vmatprep.mubr.f32.mxu1 %v780_v59 }
 0x168   : > { %1351 = vmatprep.subr.bf16.mxu1 %v1350_v56 }
 0x16b   : > { %1353 = vmatpush3.bf16.msra.mxu1 %v1350_v56 }
 0x16c   : > { %1355 = vmatprep.subr.bf16.mxu1 %v1354_v60 }
 0x16f   : > { %1357 = vmatpush3.bf16.msra.mxu1 %v1354_v60 }
 0x170   : > { %1359 = vmatprep.subr.bf16.mxu1 %v1358_v63 }
 0x173   : > { %1361 = vmatpush3.bf16.msra.mxu1 %v1358_v63 }
 0x174   : > { %1363 = vmatprep.subr.bf16.mxu1 %v1362_v2 }
 0x177   : > { %1365 = vmatpush3.bf16.msra.mxu1 %v1362_v2 }
 0x178   : > { %1367 = vmatprep.subr.bf16.mxu1 %v1366_v5 }
 0x17b   : > { %1369 = vmatpush3.bf16.msra.mxu1 %v1366_v5 }
 0x17c   : > { %1371 = vmatprep.subr.bf16.mxu1 %v1370_v8 }
 0x17f   : > { %1373 = vmatpush3.bf16.msra.mxu1 %v1370_v8 }
 0x180   : > { %1375 = vmatprep.subr.bf16.mxu1 %v1374_v11 }
 0x183   : > { %1377 = vmatpush3.bf16.msra.mxu1 %v1374_v11 }
 0x186   : > { %1232 = vmatmul.mubr.f32.vlgmr.msra.gmra.mrb[0].mxu1 %v782_v13 }
 0x236   : > { %v1163_v14 = vpop.f32.mrb[2].mxu0 }
 0x237   : > { %v646_v15 = vpop.f32.mrb[3].mxu0  ;;  %v656_v17 = vadd.f32 %v1163_v14, %v981_v16 }
 0x238   : > { %v655_v18 = vadd.f32 %v981_v16, %v646_v15 }
 0x259   : > { %v1233_v19 = vpop.f32.mrb[0].mxu1 }
 0x25a   : > { %v1381_v20 = vadd.f32 %v1233_v19, %v656_v17  ;;  %v851_v21 = vpop.f32.mrb[1].mxu1 }
 0x25b   : > { %v1383_v22 = vadd.f32 %v851_v21, %v655_v18 }
 0x25c   : > { %v863_v23 = vmax.f32 %v1381_v20, 0.0 }
 0x25d   : > { %v862_v24 = vmax.f32 %v1383_v22, 0.0 }
 0x25e   : > { %865 = vst [vmem:[%s247_s16 + $0x8] sm:$0xff] %v863_v23 }
 0x25f   : > { %864 = vst [vmem:[%s247_s16] sm:$0xff] %v862_v24 }
 0x260   : > { %1525 = shalt.err (!%p1522_p11)
}
 0x261   : > { %s1526_s9 = scalar_lea.hbm %s1789_s8, 256  ;;  %s1530_s13 = scalar_lea.hbm %s1837_s5, 512 }
 0x262   : > { %p1527_p13 = scmp.ne.s32.totalorder %s1789_s8, %s1526_s9  ;;  %p1531_p6 = scmp.lt.u32.totalorder %s1789_s8, %s1837_s5 }
 0x263   : > { %p1532_p9 = scmp.lt.u32.totalorder %s1530_s13, %s1526_s9  ;;  %p1534_p12 = scmp.lt.u32.totalorder %s1526_s9, %s1789_s8 }
 0x264   : > { %p1528_p5 = pnand %p1527_p13, %p1850_p1 }
 0x265   : > { %p1533_p10 = por %p1532_p9, %p1531_p6 }
 0x266   : > { %p1529_p0 = pneg %p1528_p5 }
 0x267   : > { %p1535_p2 = por %p1534_p12, %p1533_p10 }
 0x269   : > { %p1536_p3 = pnand %p1535_p2, %p1529_p0 }
 0x26b   : > { %1539 = shalt.err (!%p1536_p3)
}
 0x26c   : > { %s1590_s16 = smov 128   ;;  %s1591_s7 = smov 8  }
 0x26d   : > { %1399 = dma.vmem_to_hbm [thread:$0]  (%p1850_p1), %s1784_s17, 256, %s1789_s8, %s1791_s10, %s1590_s16, %s1590_s16, %s1591_s7  }
 0x26e PF: > { %p1416_p4 = scmp.ge.s32.totalorder %s1582_s21, 2  ;;  %s895_s23 = sand.u32 1, %s1570_s18  }
 0x26f   : > { %p1851_p7 = scmp.ne.s32.totalorder %s1842_s29, 0  ;;  %s896_s6 = scalar_lea.sflag [#allocation5], %s895_s23 }
 0x271   : > { %p1409_p8 = pnand %p1416_p4, %p1851_p7 }
 0x273   : > { %1565 = dma.done.wait (!%p1409_p8), %s896_s6, 256  }
 0x274   : > { %1567 = vsyncadd (!%p1409_p8), %s896_s6, 4294967040  ;;  %p17_p11 = scmp.ge.s32.totalorder %s1647_s24, 4   ;;  %s1852_s18 = smov %s1574_s19 }
 0x275   : > { %s1853_s19 = smov %s1578_s20  ;;  %s1854_s20 = smov %s1658_s27 }
 0x276   : > { %s1855_s21 = smov %s1647_s24  ;;  %19 = sbr.rel (!%p17_p11) target bundleno = 5 (0x5), region = 88 }
 0x27d   :  { %901 = vsyncpa [#allocation4], 1 }
 0x27e   :  { %903 = vsyncpa [#allocation4 + $0x1], 1 }
 0x27f   :  { %904 = vsyncpa [#allocation7], 1 }
 0x280   :  { %905 = vsyncpa [#allocation5], 1 }
 0x281   :  { %907 = vsyncpa [#allocation5 + $0x1], 1 }

</bundles_post_ra>
